<compile_context>
chip_gen: v7x
topology: tpu7x:2x2x1
jax: 0.10.0
libtpu: 0.0.40
codegen_flags: <defaults>
</compile_context>

<pallas_src>
import functools

import jax
import jax.numpy as jnp
from jax.experimental import pallas as pl
from jax.experimental.pallas import tpu as pltpu


# ----------------------------------------------------------------------------
# Kernel 1: ConvTranspose2d(k=2, s=2) as a channel matmul.
#   out[n, (ky*2+kx)*C_half + co, i, j] = sum_ci W[ci, co, ky, kx] * x[n, ci, i, j] + b[co]
# The depth-to-space (pixel shuffle) that interleaves the 4 sub-planes is a tiny,
# op-inherent rearrangement done in the wrapper.
# ----------------------------------------------------------------------------
def _conv_transpose_1x1_kernel(x_ref, w_ref, b_ref, o_ref):
    # x_ref: (1, C_in, HW)   w_ref: (4*C_half, C_in)   b_ref: (4*C_half, 1)
    acc = jnp.dot(w_ref[...], x_ref[0], preferred_element_type=jnp.float32)
    o_ref[0] = (acc + b_ref[...]).astype(o_ref.dtype)


def conv_transpose_2x2_s2(x, weight, bias):
    """ConvTranspose2d(C_in, C_in//2, kernel_size=2, stride=2) forward (NCHW)."""
    n, c_in, h, w = x.shape
    c_half = weight.shape[1]
    c4 = 4 * c_half
    hw = h * w

    x_flat = x.reshape(n, c_in, hw)                                   # free reshape
    # W[ci, co, ky, kx] -> Wmat[(ky*2+kx)*C_half + co, ci]
    w_mat = jnp.transpose(weight, (2, 3, 1, 0)).reshape(c4, c_in)
    b_mat = jnp.tile(bias, 4).reshape(c4, 1)

    out_flat = pl.pallas_call(
        _conv_transpose_1x1_kernel,
        out_shape=jax.ShapeDtypeStruct((n, c4, hw), x.dtype),
        grid_spec=pltpu.PrefetchScalarGridSpec(
            num_scalar_prefetch=0,
            grid=(n,),
            in_specs=[
                pl.BlockSpec((1, c_in, hw), lambda i: (i, 0, 0)),
                pl.BlockSpec((c4, c_in), lambda i: (0, 0)),
                pl.BlockSpec((c4, 1), lambda i: (0, 0)),
            ],
            out_specs=pl.BlockSpec((1, c4, hw), lambda i: (i, 0, 0)),
        ),
        compiler_params=pltpu.CompilerParams(dimension_semantics=("parallel",)),
        cost_estimate=pl.CostEstimate(
            flops=2 * n * c4 * c_in * hw,
            transcendentals=0,
            bytes_accessed=4 * (n * c_in * hw + c4 * c_in + c4 + n * c4 * hw),
        ),
    )(x_flat, w_mat, b_mat)

    # depth-to-space: (N, ky, kx, C_half, H, W) -> (N, C_half, 2H, 2W)
    y = out_flat.reshape(n, 2, 2, c_half, h, w)
    y = jnp.transpose(y, (0, 3, 4, 1, 5, 2)).reshape(n, c_half, 2 * h, 2 * w)
    return y


# ----------------------------------------------------------------------------
# Kernel 2: fused DoubleConv = (conv3x3 valid + BN(eval, folded) + ReLU) x 2.
# Operates on the row-major flattened image (row width = W).  Each conv is 9 shifted
# matmuls; right-edge columns that wrap into the next row are garbage and are never
# read by valid outputs; they are cropped in the wrapper.
# ----------------------------------------------------------------------------
def _double_conv_kernel(x_ref, w1_ref, b1_ref, w2_ref, b2_ref, o_ref, *, row_w, l1, l2):
    # x_ref : (1, C_cat, Lin)   flattened, zero-padded input for one sample
    # w1_ref: (9, C_mid, C_cat) b1_ref: (C_mid, 1)   (BN already folded in)
    # w2_ref: (9, C_out, C_mid) b2_ref: (C_out, 1)
    # o_ref : (1, C_out, l2)
    c_mid = w1_ref.shape[1]
    c_out = w2_ref.shape[1]

    # conv1 + BN + ReLU  (full-row-width convention, l1 output lanes)
    h1 = jnp.zeros((c_mid, l1), dtype=jnp.float32)
    for ky in range(3):
        for kx in range(3):
            tap = ky * 3 + kx
            shift = ky * row_w + kx
            xs = x_ref[0, :, pl.ds(shift, l1)]                 # (C_cat, l1), contiguous lanes
            h1 = h1 + jnp.dot(w1_ref[tap], xs, preferred_element_type=jnp.float32)
    h1 = jnp.maximum(h1 + b1_ref[...], 0.0)

    # conv2 + BN + ReLU, reading the VMEM-resident intermediate (never hits HBM)
    h2 = jnp.zeros((c_out, l2), dtype=jnp.float32)
    for ky in range(3):
        for kx in range(3):
            tap = ky * 3 + kx
            shift = ky * row_w + kx
            h2 = h2 + jnp.dot(w2_ref[tap], h1[:, shift:shift + l2],
                              preferred_element_type=jnp.float32)
    o_ref[0] = jnp.maximum(h2 + b2_ref[...], 0.0).astype(o_ref.dtype)


def double_conv_fused(x, w1, b1, bn1, w2, b2, bn2, *, eps=1e-5):
    """DoubleConv forward on NCHW input x of shape (N, C_cat, H, W)."""
    n, c_cat, h, w = x.shape
    c_mid = w1.shape[0]
    c_out = w2.shape[0]
    assert h >= 5 and w >= 5, "DoubleConv (two valid 3x3 convs) needs H, W >= 5"

    # Fold inference-mode BatchNorm into the conv weights/bias.
    g1, beta1, m1, v1 = bn1
    g2, beta2, m2, v2 = bn2
    s1 = g1 / jnp.sqrt(v1 + eps)
    s2 = g2 / jnp.sqrt(v2 + eps)
    w1f = w1 * s1[:, None, None, None]
    b1f = (b1 - m1) * s1 + beta1
    w2f = w2 * s2[:, None, None, None]
    b2f = (b2 - m2) * s2 + beta2

    # Pack weights as 9 taps of (C_out, C_in), tap index = ky*3 + kx.
    w1t = jnp.transpose(w1f, (2, 3, 0, 1)).reshape(9, c_mid, c_cat)
    w2t = jnp.transpose(w2f, (2, 3, 0, 1)).reshape(9, c_out, c_mid)
    b1m = b1f.reshape(c_mid, 1)
    b2m = b2f.reshape(c_out, 1)

    # Two extra zero rows at the bottom keep every in-kernel tap slice in bounds.
    xp = jnp.pad(x, ((0, 0), (0, 0), (0, 2), (0, 0)))
    lin = (h + 2) * w              # flattened (padded) input lanes per channel
    l1 = (h - 1) * w               # conv1 output lanes (rows 0..H-2, full width)
    l2 = (h - 4) * w               # conv2 output lanes (rows 0..H-5, full width)
    x_flat = xp.reshape(n, c_cat, lin)

    kernel = functools.partial(_double_conv_kernel, row_w=w, l1=l1, l2=l2)

    out_flat = pl.pallas_call(
        kernel,
        out_shape=jax.ShapeDtypeStruct((n, c_out, l2), x.dtype),
        grid_spec=pltpu.PrefetchScalarGridSpec(
            num_scalar_prefetch=0,
            grid=(n,),
            in_specs=[
                pl.BlockSpec((1, c_cat, lin), lambda i: (i, 0, 0)),
                pl.BlockSpec((9, c_mid, c_cat), lambda i: (0, 0, 0)),
                pl.BlockSpec((c_mid, 1), lambda i: (0, 0)),
                pl.BlockSpec((9, c_out, c_mid), lambda i: (0, 0, 0)),
                pl.BlockSpec((c_out, 1), lambda i: (0, 0)),
            ],
            out_specs=pl.BlockSpec((1, c_out, l2), lambda i: (i, 0, 0)),
        ),
        compiler_params=pltpu.CompilerParams(dimension_semantics=("parallel",)),
        cost_estimate=pl.CostEstimate(
            flops=2 * n * 9 * (c_mid * c_cat * l1 + c_out * c_mid * l2),
            transcendentals=0,
            bytes_accessed=4 * (n * c_cat * lin + n * c_out * l2
                                + 9 * (c_mid * c_cat + c_out * c_mid) + c_mid + c_out),
        ),
    )(x_flat, w1t, b1m, w2t, b2m)

    # Crop the 4 garbage right-edge columns per row (the only post-kernel data movement).
    out = out_flat.reshape(n, c_out, h - 4, w)[:, :, :, : w - 4]
    return out


# ----------------------------------------------------------------------------
# Full `up.forward(x1, x2)`
# ----------------------------------------------------------------------------
def up_forward(x1, x2, p):
    x1u = conv_transpose_2x2_s2(x1, p["up_w"], p["up_b"])
    diff_y = x2.shape[2] - x1u.shape[2]
    diff_x = x2.shape[3] - x1u.shape[3]
    x1p = jnp.pad(
        x1u,
        ((0, 0), (0, 0),
         (diff_y // 2, diff_y - diff_y // 2),
         (diff_x // 2, diff_x - diff_x // 2)),
    )
    xcat = jnp.concatenate([x2, x1p], axis=1)          # NCHW concat, no transpose
    return double_conv_fused(
        xcat,
        p["w1"], p["b1"], (p["g1"], p["beta1"], p["m1"], p["v1"]),
        p["w2"], p["b2"], (p["g2"], p["beta2"], p["m2"], p["v2"]),
    )


# ----------------------------------------------------------------------------
# Pure-JAX reference (eval-mode BatchNorm) for the correctness check.
# ----------------------------------------------------------------------------
def _ref_bn(y, g, b, m, v, eps=1e-5):
    s = g / jnp.sqrt(v + eps)
    return (y - m[None, :, None, None]) * s[None, :, None, None] + b[None, :, None, None]


def ref_up_forward(x1, x2, p):
    hp = jax.lax.Precision.HIGHEST
    n, _, h1s, w1s = x1.shape
    c_half = p["up_w"].shape[1]
    t = jnp.einsum("ncij,cokl->noikjl", x1, p["up_w"], precision=hp)
    x1u = t.reshape(n, c_half, 2 * h1s, 2 * w1s) + p["up_b"][None, :, None, None]
    diff_y = x2.shape[2] - x1u.shape[2]
    diff_x = x2.shape[3] - x1u.shape[3]
    x1p = jnp.pad(
        x1u,
        ((0, 0), (0, 0),
         (diff_y // 2, diff_y - diff_y // 2),
         (diff_x // 2, diff_x - diff_x // 2)),
    )
    x = jnp.concatenate([x2, x1p], axis=1)

    def conv(x, w, b):
        y = jax.lax.conv_general_dilated(
            x, w, (1, 1), "VALID",
            dimension_numbers=("NCHW", "OIHW", "NCHW"), precision=hp)
        return y + b[None, :, None, None]

    y = jnp.maximum(_ref_bn(conv(x, p["w1"], p["b1"]), p["g1"], p["beta1"], p["m1"], p["v1"]), 0.0)
    y = jnp.maximum(_ref_bn(conv(y, p["w2"], p["b2"]), p["g2"], p["beta2"], p["m2"], p["v2"]), 0.0)
    return y


if __name__ == "__main__":
    key = jax.random.PRNGKey(0)
    keys = jax.random.split(key, 16)

    N, IN_CH, OUT_CH = 2, 4, 3
    C_HALF = IN_CH // 2
    H1, W1 = 8, 8            # x1 spatial (pre-upsample)
    H2, W2 = 16, 16          # x2 spatial (skip connection)

    x1 = jax.random.normal(keys[0], (N, IN_CH, H1, W1), dtype=jnp.float32)
    x2 = jax.random.normal(keys[1], (N, C_HALF, H2, W2), dtype=jnp.float32)

    params = {
        # ConvTranspose2d(IN_CH, IN_CH//2, kernel_size=2, stride=2)
        "up_w": jax.random.normal(keys[2], (IN_CH, C_HALF, 2, 2), dtype=jnp.float32) * 0.2,
        "up_b": jax.random.normal(keys[3], (C_HALF,), dtype=jnp.float32) * 0.1,
        # DoubleConv conv1: Conv2d(IN_CH, OUT_CH, 3) + BN(OUT_CH)
        "w1": jax.random.normal(keys[4], (OUT_CH, IN_CH, 3, 3), dtype=jnp.float32) * 0.2,
        "b1": jax.random.normal(keys[5], (OUT_CH,), dtype=jnp.float32) * 0.1,
        "g1": 1.0 + 0.1 * jax.random.normal(keys[6], (OUT_CH,), dtype=jnp.float32),
        "beta1": 0.1 * jax.random.normal(keys[7], (OUT_CH,), dtype=jnp.float32),
        "m1": 0.1 * jax.random.normal(keys[8], (OUT_CH,), dtype=jnp.float32),
        "v1": jax.random.uniform(keys[9], (OUT_CH,), jnp.float32, 0.5, 1.5),
        # DoubleConv conv2: Conv2d(OUT_CH, OUT_CH, 3) + BN(OUT_CH)
        "w2": jax.random.normal(keys[10], (OUT_CH, OUT_CH, 3, 3), dtype=jnp.float32) * 0.2,
        "b2": jax.random.normal(keys[11], (OUT_CH,), dtype=jnp.float32) * 0.1,
        "g2": 1.0 + 0.1 * jax.random.normal(keys[12], (OUT_CH,), dtype=jnp.float32),
        "beta2": 0.1 * jax.random.normal(keys[13], (OUT_CH,), dtype=jnp.float32),
        "m2": 0.1 * jax.random.normal(keys[14], (OUT_CH,), dtype=jnp.float32),
        "v2": jax.random.uniform(keys[15], (OUT_CH,), jnp.float32, 0.5, 1.5),
    }

    out = up_forward(x1, x2, params)
    out = jax.block_until_ready(out)

    ref = ref_up_forward(x1, x2, params)
    assert out.shape == (N, OUT_CH, H2 - 4, W2 - 4), out.shape
    assert jnp.allclose(out, ref, atol=1e-4, rtol=1e-4), "mismatch vs reference"

    # TODO(synk): BatchNorm2d is implemented in inference mode (running stats folded
    # into the conv); training-mode batch-statistic computation is not implemented.
    print("KERNEL_OK")
</pallas_src>

<mosaic_0001>
module attributes {stable_mosaic.version = 11 : i64} {
  func.func @_conv_transpose_1x1_kernel(%arg0: i32, %arg1: memref<1x4x64xf32, #tpu.memory_space<vmem>>, %arg2: memref<8x4xf32, #tpu.memory_space<vmem>>, %arg3: memref<8x1xf32, #tpu.memory_space<vmem>>, %arg4: memref<1x8x64xf32, #tpu.memory_space<vmem>>) attributes {dimension_semantics = [#tpu.dimension_semantics<parallel>], iteration_bounds = array<i64: 2>, scalar_prefetch = 0 : i64, scratch_operands = 0 : i64, tpu.core_type = #tpu.core_type<tc>, window_params = [{transform_indices = @transform_0, window_bounds = array<i64: 1, 4, 64>}, {pipeline_mode = #tpu.pipeline_mode<synchronous>, transform_indices = @transform_1, window_bounds = array<i64: 8, 4>}, {pipeline_mode = #tpu.pipeline_mode<synchronous>, transform_indices = @transform_2, window_bounds = array<i64: 8, 1>}, {transform_indices = @transform_3, window_bounds = array<i64: 1, 8, 64>}]} {
    %c0 = arith.constant 0 : index
    %c0_0 = arith.constant 0 : index
    %0 = vector.load %arg2[%c0, %c0_0] : memref<8x4xf32, #tpu.memory_space<vmem>>, vector<8x4xf32>
    %c0_1 = arith.constant 0 : index
    %c0_2 = arith.constant 0 : index
    %c0_3 = arith.constant 0 : index
    %1 = vector.load %arg1[%c0_1, %c0_2, %c0_3] : memref<1x4x64xf32, #tpu.memory_space<vmem>>, vector<1x4x64xf32>
    %2 = vector.shape_cast %1 : vector<1x4x64xf32> to vector<4x64xf32>
    %cst = arith.constant dense<0.000000e+00> : vector<8x64xf32>
    %3 = tpu.matmul %0, %2, %cst {dimension_numbers = #tpu.dot_dimension_numbers<[1], [0], [0], [1], [0, 0, 1, 1], [], []>} : vector<8x4xf32>, vector<4x64xf32>, vector<8x64xf32> -> vector<8x64xf32>
    %c0_4 = arith.constant 0 : index
    %c0_5 = arith.constant 0 : index
    %4 = vector.load %arg3[%c0_4, %c0_5] : memref<8x1xf32, #tpu.memory_space<vmem>>, vector<8x1xf32>
    %5 = vector.broadcast %4 : vector<8x1xf32> to vector<8x64xf32>
    %6 = arith.addf %3, %5 : vector<8x64xf32>
    %c0_6 = arith.constant 0 : index
    %c0_7 = arith.constant 0 : index
    %c0_8 = arith.constant 0 : index
    %7 = vector.load %arg4[%c0_6, %c0_7, %c0_8] : memref<1x8x64xf32, #tpu.memory_space<vmem>>, vector<1x8x64xf32>
    %8 = vector.shape_cast %7 : vector<1x8x64xf32> to vector<8x64xf32>
    %9 = vector.shape_cast %6 : vector<8x64xf32> to vector<1x8x64xf32>
    tpu.vector_store %arg4[%c0_6, %c0_7, %c0_8], %9 {strides = array<i32>} : memref<1x8x64xf32, #tpu.memory_space<vmem>>, vector<1x8x64xf32>,
    return
  }
  func.func @transform_0(%arg0: i32) -> (i32, i32, i32) {
    %c0_i32 = arith.constant 0 : i32
    %c0_i32_0 = arith.constant 0 : i32
    %c0_i32_1 = arith.constant 0 : i32
    return %arg0, %c0_i32, %c0_i32_0 : i32, i32, i32
  }
  func.func @transform_1(%arg0: i32) -> (i32, i32) {
    %c0_i32 = arith.constant 0 : i32
    %c0_i32_0 = arith.constant 0 : i32
    %c0_i32_1 = arith.constant 0 : i32
    return %c0_i32, %c0_i32_0 : i32, i32
  }
  func.func @transform_2(%arg0: i32) -> (i32, i32) {
    %c0_i32 = arith.constant 0 : i32
    %c0_i32_0 = arith.constant 0 : i32
    %c0_i32_1 = arith.constant 0 : i32
    return %c0_i32, %c0_i32_0 : i32, i32
  }
  func.func @transform_3(%arg0: i32) -> (i32, i32, i32) {
    %c0_i32 = arith.constant 0 : i32
    %c0_i32_0 = arith.constant 0 : i32
    %c0_i32_1 = arith.constant 0 : i32
    return %arg0, %c0_i32, %c0_i32_0 : i32, i32, i32
  }
}

</mosaic_0001>

<bundles_post_ra>
// kernel: tpu_custom_call.1
= control target key start
LH: loop header
LB: loop body
LE: loop exit
PB: predicated region body
PF: predicated region fallthrough
CT: control target
= control target key end

     0   :  { %8 = vsyncpa [#allocation3], 0  ;;  %s583_s0 = inlined_call_operand.vmem [shape: f32[2,4,64], index: 0, kind: input, shape index: {}]   ;;  %s584_s1 = inlined_call_operand.vmem [shape: f32[8,4], index: 1, kind: input, shape index: {}]   ;;  %s585_s2 = inlined_call_operand.vmem [shape: f32[8,1], index: 2, kind: input, shape index: {}]   ;;  %s586_s3 = inlined_call_operand.hbm [shape: f32[2,8,64], index: 3, kind: output, shape index: {}]  }
   0x1   :  { %10 = vsyncpa [#allocation3 + $0x1], 0  ;;  %s477_s12 = smov 0   ;;  %s479_s13 = smov 0  }
   0x2   :  { %s481_s14 = smov 0   ;;  %s483_s15 = smov 0  }
   0x3 LB: > { %s498_s16 = sadd.s32 4294967295, %s451_s15   ;;  %s327_s17 = sadd.s32 4294967294, %s451_s15   ;;  %s451_s15 = sphi %s483_s15, %s592_s15   ;;  %s447_s14 = sphi %s481_s14, %s591_s14   ;;  %s443_s13 = sphi %s479_s13, %s590_s13   ;;  %s439_s12 = sphi %s477_s12, %s589_s12  }
   0x4   : > { %s502_s18 = sadd.s32 1, %s451_s15   ;;  %s91_s19 = sadd.s32 1, %s447_s14 }
   0x5   : > { %s88_s20 = ssub.s32 %s451_s15, %s502_s18  ;;  %p101_p0 = scmp.ne.s32.totalorder %s447_s14, %s443_s13 }
   0x6   : > { %p89_p1 = scmp.eq.s32.totalorder %s88_s20, 0  ;;  %p102_p2 = scmp.eq.s32.totalorder %s498_s16, 1 }
   0x7   : > { %p107_p3 = scmp.ne.s32.totalorder %s443_s13, %s439_s12  ;;  %p108_p4 = scmp.eq.s32.totalorder %s327_s17, 1 }
   0x8   : > { %s513_s21 = scalar_select %p89_p1, %s447_s14, %s91_s19  }
   0x9   : > { %p515_p5 = por %p102_p2, %p101_p0  ;;  %p519_p6 = por %p108_p4, %p107_p3 }
   0xa   : > { %p330_p7 = scmp.ge.s32.totalorder %s451_s15, 1  ;;  %p139_p8 = scmp.lt.s32.totalorder %s451_s15, 3 }
   0xc   : > { %p140_p9 = pnand %p330_p7, %p139_p8 }
   0xd   : > { %p162_p10 = scmp.lt.s32.totalorder (!%p140_p9), %s498_s16, 1  ;;  %v453_v0 = vmov (!%p140_p9), 0.0   ;;  %vm454_vm0 = vmmov (!%p140_p9), 0   ;;  %v168_v1 = vld [vmem:[%s585_s2] sm:$0xff] (!%p140_p9)  ;;  %v455_v2 = vmov (!%p140_p9), 0   ;;  %vm178_vm1 = vcmask (!%p140_p9), 1043456  }
   0xe   : > { %143 = sbr.rel (%p140_p9) target bundleno = 255 (0xff), region = 32  ;;  %341 = vmatprep.subr.mxu0 (!%p140_p9), %v453_v0  ;;  %343 = vmatprep.mubr.msk.f32.mxu0 (!%p140_p9), %vm454_vm0, %v453_v0  ;;  %v166_v3 = vld [vmem:[%s584_s1] sm:$0xff] (!%p140_p9)  ;;  %vm174_vm2 = vcmask (!%p140_p9), 31744   ;;  %s159_s6 = sand.u32 (!%p140_p9), 1, %s443_s13   ;;  %vm252_vm3 = vcmask (!%p140_p9), 523264  }
   0xf   : > { %388 = vset.pattern.permute.xlu0 (!%p140_p9), %v455_v2  ;;  %s331_s7 = sshll.u32 (!%p140_p9), %s159_s6, 3  ;;  %s336_s8 = sshll.u32 (!%p140_p9), %s498_s16, 7 }
  0x10   : > { %171 = vperm.xlu0 (!%p140_p9), %388, %v168_v1   ;;  %s161_s9 = scalar_lea.vmem (!%p140_p9), [#allocation2], %s331_s7  ;;  %s541_s19 = scalar_lea.hbm (!%p140_p9), %s586_s3, %s336_s8 }
  0x11   : > { %s268_s10 = sshll.u32 (!%p140_p9), %s161_s9, 4  ;;  %s255_s20 = scalar_lea.sflag (!%p140_p9), [#allocation3], %s159_s6  ;;  %s543_s10 = int_to_ptr.vmem [resolvable:$true] %s268_s10 }
  0x12   : > { %s389_s24 = scalar_lea.vmem (!%p140_p9), %s543_s10, 128 }
  0x13   : > { %p390_p11 = scmp.ne.s32.totalorder (!%p140_p9), %s543_s10, %s389_s24 }
  0x15   : > { %s163_s26 = scalar_select %p162_p10, %s498_s16, 1 }
  0x16   : > { %p391_p12 = pnand %p390_p11, %p515_p5  ;;  %s456_s16 = smov [#allocation2]  }
  0x17   : > { %s332_s27 = sshll.u32 %s163_s26, 2  ;;  %s393_s25 = sshll.u32 %s456_s16, 4  ;;  %s394_s25 = int_to_ptr.vmem [resolvable:$false] %s393_s25 }
  0x18   : > { %s165_s30 = scalar_lea.vmem %s583_s0, %s332_s27  ;;  %p392_p13 = pneg %p391_p12 }
  0x19   : > { %v167_v4 = vld [vmem:[%s165_s30] sm:$0xf]  ;;  %s395_s26 = scalar_lea.vmem %s394_s25, 256  ;;  %p396_p0 = scmp.lt.s32.totalorder %s543_s10, %s394_s25 }
  0x1a   : > { %342 = vmatpush3.msk.msra.mxu0 %vm178_vm1, %v167_v4  ;;  %p397_p1 = scmp.lt.s32.totalorder %s395_s26, %s389_s24 }
  0x1b   : > { %344 = vmatmul.mubr.msk.f32.vlgmr.msra.gmra.mrb[0].mxu0 %vm174_vm2, %v166_v3 }
  0x1c   : > { %p398_p2 = por %p397_p1, %p396_p0 }
  0x1e   : > { %p399_p3 = pnand %p398_p2, %p392_p13 }
  0x8f   : > { %v172_v5 = vpop.permute.xlu0 %171 }
  0xee   : > { %v248_v6 = vpop.f32.mrb[0].mxu0 }
  0xef   : > { %v249_v7 = vadd.f32 %v248_v6, %v172_v5  ;;  %v345_v8 = vpop.f32.mrb[1].mxu0 }
  0xf1   : > { %253 = vst.msk [vmem:[%s161_s9] sm:$0xff] %vm252_vm3, %v249_v7 }
  0xf2   : > { %402 = shalt.err (!%p399_p3)
}
  0xf3   : > { %s403_s27 = scalar_lea.hbm %s541_s19, 128  ;;  %s407_s30 = scalar_lea.hbm %s586_s3, 256 }
  0xf4   : > { %p404_p4 = scmp.ne.s32.totalorder %s541_s19, %s403_s27  ;;  %p408_p9 = scmp.lt.u32.totalorder %s541_s19, %s586_s3 }
  0xf5   : > { %p409_p10 = scmp.lt.u32.totalorder %s407_s30, %s403_s27  ;;  %p411_p12 = scmp.lt.u32.totalorder %s403_s27, %s541_s19 }
  0xf6   : > { %p405_p7 = pnand %p404_p4, %p515_p5 }
  0xf7   : > { %p410_p11 = por %p409_p10, %p408_p9 }
  0xf8   : > { %p406_p8 = pneg %p405_p7 }
  0xf9   : > { %p412_p13 = por %p411_p12, %p410_p11 }
  0xfb   : > { %p413_p0 = pnand %p412_p13, %p406_p8 }
  0xfd   : > { %416 = shalt.err (!%p413_p0)
}
  0xfe   : > { %346 = dma.vmem_to_hbm [thread:$0]  (%p515_p5), %s543_s10, 128, %s541_s19, %s255_s20  }
  0xff PF: > { %p352_p1 = scmp.ge.s32.totalorder %s451_s15, 2  ;;  %s280_s6 = sand.u32 1, %s439_s12  }
 0x100   : > { %s281_s7 = scalar_lea.sflag [#allocation3], %s280_s6 }
 0x101   : > { %p349_p2 = pnand %p352_p1, %p519_p6 }
 0x103   : > { %434 = dma.done.wait (!%p349_p2), %s281_s7, 128  }
 0x104   : > { %436 = vsyncadd (!%p349_p2), %s281_s7, 4294967168  ;;  %p13_p3 = scmp.ge.s32.totalorder %s502_s18, 4   ;;  %s589_s12 = smov %s443_s13 }
 0x105   : > { %s590_s13 = smov %s447_s14  ;;  %s591_s14 = smov %s513_s21 }
 0x106   : > { %s592_s15 = smov %s502_s18  ;;  %15 = sbr.rel (!%p13_p3) target bundleno = 3 (0x3), region = 67 }
 0x10d   :  { %286 = vsyncpa [#allocation3], 1 }
 0x10e   :  { %288 = vsyncpa [#allocation3 + $0x1], 1 }

</bundles_post_ra>
